<compile_context>
chip_gen: v5e
topology: v5e:2x2
jax: 0.10.0
libtpu: 0.0.40
codegen_flags: <defaults>
</compile_context>

<pallas_src>
import functools

import jax
import jax.numpy as jnp
from jax import lax
from jax.experimental import pallas as pl
from jax.experimental.pallas import tpu as pltpu


# ----------------------------------------------------------------------------
# Fused Pallas kernel: all heads + out_att + elu + log_softmax, one batch / step
# ----------------------------------------------------------------------------
def _gat_fused_kernel(x_ref, adj_ref, w_all_ref, a1_blk_ref, a2_blk_ref,
                      w_out_ref, a1o_ref, a2o_ref, o_ref, *,
                      alpha, n_heads, f_hid):
    x = x_ref[0]                                   # (N, Fin)
    adj = adj_ref[...]                             # (N, N)

    # ---- all heads: one projection matmul (N, Fin) @ (Fin, H*Fh) on the MXU ----
    h_all = jnp.dot(x, w_all_ref[...], preferred_element_type=jnp.float32)   # (N, H*Fh)
    g_all = jnp.where(h_all > 0, h_all, alpha * h_all)                       # leakyrelu

    # per-head scores via block-diagonal `a` matrices (MXU, no transpose / XLU reduce):
    #   s1_all[:, hd] = leakyrelu(h_hd) . a_hd[:Fh]
    #   s2_all[hd, :] = leakyrelu(h_hd) . a_hd[Fh:]
    s1_all = jnp.dot(g_all, a1_blk_ref[...],
                     preferred_element_type=jnp.float32)                     # (N, H)
    s2_all = lax.dot_general(a2_blk_ref[...], g_all, (((1,), (1,)), ((), ())),
                             preferred_element_type=jnp.float32)             # (H, N)

    def attend(h_f, e):
        dj = 0.8 * adj + 0.2 * e
        att = jnp.where(dj > 0, dj, jnp.float32(-1e12))
        # softmax over dim=1 of (B, N, N) == axis 0 of the per-batch (N, N) tile
        att = att - jnp.max(att, axis=0, keepdims=True)
        p = jnp.exp(att)
        att_n = p * pl.reciprocal(jnp.sum(p, axis=0, keepdims=True), approx=True)
        hp = jnp.dot(att_n, h_f, preferred_element_type=jnp.float32)
        return jnp.maximum(hp, 0.0)                                          # F.relu

    head_outs = []
    for hd in range(n_heads):                      # static unroll (n_heads is small)
        e_hd = s1_all[:, hd:hd + 1] + s2_all[hd:hd + 1, :]                   # (N, N)
        h_hd = h_all[:, hd * f_hid:(hd + 1) * f_hid]                         # (N, Fh)
        head_outs.append(attend(h_hd, e_hd))
    x2 = jnp.concatenate(head_outs, axis=1)                                  # (N, H*Fh)

    # ---- output attention layer (concat=False branch also returns relu) ----
    h2 = jnp.dot(x2, w_out_ref[...], preferred_element_type=jnp.float32)     # (N, C)
    g2 = jnp.where(h2 > 0, h2, alpha * h2)
    s1 = jnp.dot(g2, a1o_ref[...], preferred_element_type=jnp.float32)       # (N, 1)
    s2 = lax.dot_general(a2o_ref[...], g2, (((1,), (1,)), ((), ())),
                         preferred_element_type=jnp.float32)                 # (1, N)
    hp2 = attend(h2, s1 + s2)                                                # (N, C)

    # ---- fused epilogue: ELU then log_softmax over the feature axis ----
    y = jnp.where(hp2 > 0, hp2, jnp.exp(jnp.minimum(hp2, 0.0)) - 1.0)
    z = y - jnp.max(y, axis=-1, keepdims=True)
    lse = jnp.log(jnp.sum(jnp.exp(z), axis=-1, keepdims=True))
    o_ref[0] = (z - lse).astype(o_ref.dtype)


# ----------------------------------------------------------------------------
# Wrapper around pallas_call (packs per-head weights, one kernel for everything)
# ----------------------------------------------------------------------------
def gat_forward(params, x, adj, alpha):
    """x: (B, N, Fin), adj: (N, N) -> (B, N, n_class) log-probabilities."""
    B, N, Fin = x.shape
    heads = params["heads"]
    H = len(heads)
    Fh = heads[0][0].shape[1]
    C = params["out_W"].shape[1]

    # Pack head parameters (host/XLA side, traced once).
    w_all = jnp.concatenate([W for (W, _) in heads], axis=1)                 # (Fin, H*Fh)
    a1_blk = jnp.zeros((H * Fh, H), jnp.float32)
    a2_blk = jnp.zeros((H, H * Fh), jnp.float32)
    for hd, (_, a) in enumerate(heads):
        a1_blk = a1_blk.at[hd * Fh:(hd + 1) * Fh, hd].set(a[:Fh, 0])
        a2_blk = a2_blk.at[hd, hd * Fh:(hd + 1) * Fh].set(a[Fh:, 0])
    a1o = params["out_a"][:C]                                                # (C, 1)
    a2o = params["out_a"][C:, 0].reshape(1, C)                               # (1, C)

    kernel = functools.partial(_gat_fused_kernel, alpha=alpha,
                               n_heads=H, f_hid=Fh)
    return pl.pallas_call(
        kernel,
        out_shape=jax.ShapeDtypeStruct((B, N, C), jnp.float32),
        grid=(B,),
        in_specs=[
            pl.BlockSpec((1, N, Fin), lambda b: (b, 0, 0)),
            pl.BlockSpec((N, N), lambda b: (0, 0)),
            pl.BlockSpec((Fin, H * Fh), lambda b: (0, 0)),
            pl.BlockSpec((H * Fh, H), lambda b: (0, 0)),
            pl.BlockSpec((H, H * Fh), lambda b: (0, 0)),
            pl.BlockSpec((H * Fh, C), lambda b: (0, 0)),
            pl.BlockSpec((C, 1), lambda b: (0, 0)),
            pl.BlockSpec((1, C), lambda b: (0, 0)),
        ],
        out_specs=pl.BlockSpec((1, N, C), lambda b: (b, 0, 0)),
        compiler_params=pltpu.CompilerParams(dimension_semantics=("parallel",)),
    )(x, adj, w_all, a1_blk, a2_blk, params["out_W"], a1o, a2o)


# ----------------------------------------------------------------------------
# Pure-JAX reference (for correctness check)
# ----------------------------------------------------------------------------
def _ref_gat_layer(x, adj, W, a, alpha):
    h = x @ W                                                # (B, N, F)
    g = jnp.where(h > 0, h, alpha * h)
    Fo = W.shape[1]
    s1 = g @ a[:Fo, 0]                                       # (B, N)
    s2 = g @ a[Fo:, 0]                                       # (B, N)
    e = s1[:, :, None] + s2[:, None, :]                      # (B, N, N)
    dj = 0.8 * adj[None] + 0.2 * e
    att = jnp.where(dj > 0, dj, -1e12)
    att = jax.nn.softmax(att, axis=1)
    hp = jnp.einsum('bij,bjf->bif', att, h)
    return jnp.maximum(hp, 0.0)


def _ref_forward(params, x, adj, alpha):
    outs = [_ref_gat_layer(x, adj, W, a, alpha) for (W, a) in params["heads"]]
    x2 = jnp.concatenate(outs, axis=2)
    o = _ref_gat_layer(x2, adj, params["out_W"], params["out_a"], alpha)
    y = jnp.where(o > 0, o, jnp.exp(jnp.minimum(o, 0.0)) - 1.0)
    return jax.nn.log_softmax(y, axis=2)


# ----------------------------------------------------------------------------
# Parameter init (deterministic, xavier-uniform with gain=1.414 like the module)
# ----------------------------------------------------------------------------
def xavier_uniform(key, shape, gain=1.414):
    fan_in, fan_out = shape[0], shape[1]
    bound = gain * jnp.sqrt(6.0 / (fan_in + fan_out))
    return jax.random.uniform(key, shape, jnp.float32, -bound, bound)


def init_gat_params(key, n_feat, n_hid, n_class, n_heads):
    params = {"heads": []}
    for _ in range(n_heads):
        key, k1, k2 = jax.random.split(key, 3)
        W = xavier_uniform(k1, (n_feat, n_hid))
        a = xavier_uniform(k2, (2 * n_hid, 1))
        params["heads"].append((W, a))
    key, k1, k2 = jax.random.split(key, 3)
    params["out_W"] = xavier_uniform(k1, (n_hid * n_heads, n_class))
    params["out_a"] = xavier_uniform(k2, (2 * n_class, 1))
    return params


# ----------------------------------------------------------------------------
# Main
# ----------------------------------------------------------------------------
if __name__ == "__main__":
    B, N = 2, 8            # batch, nodes ("channel" in the PyTorch forward)
    n_feat, n_hid, n_class, n_heads = 16, 8, 4, 2
    alpha = 0.2

    key = jax.random.PRNGKey(0)
    kx, kadj, kp = jax.random.split(key, 3)

    x = jax.random.normal(kx, (B, N, n_feat), dtype=jnp.float32)
    adj = (jax.random.uniform(kadj, (N, N)) > 0.5).astype(jnp.float32)

    params = init_gat_params(kp, n_feat, n_hid, n_class, n_heads)

    fwd = jax.jit(functools.partial(gat_forward, alpha=alpha))
    out = jax.block_until_ready(fwd(params, x, adj))

    ref = _ref_forward(params, x, adj, alpha)
    assert out.shape == (B, N, n_class)
    assert jnp.all(jnp.isfinite(out))
    assert jnp.allclose(out, ref, atol=1e-2, rtol=1e-2), \
        float(jnp.max(jnp.abs(out - ref)))
    print("KERNEL_OK")
</pallas_src>

<mosaic_0001>
module attributes {stable_mosaic.version = 11 : i64} {
  func.func @_gat_fused_kernel(%arg0: i32, %arg1: memref<1x8x16xf32, #tpu.memory_space<vmem>>, %arg2: memref<8x8xf32, #tpu.memory_space<vmem>>, %arg3: memref<16x16xf32, #tpu.memory_space<vmem>>, %arg4: memref<16x2xf32, #tpu.memory_space<vmem>>, %arg5: memref<2x16xf32, #tpu.memory_space<vmem>>, %arg6: memref<16x4xf32, #tpu.memory_space<vmem>>, %arg7: memref<4x1xf32, #tpu.memory_space<vmem>>, %arg8: memref<1x4xf32, #tpu.memory_space<vmem>>, %arg9: memref<1x8x4xf32, #tpu.memory_space<vmem>>) attributes {dimension_semantics = [#tpu.dimension_semantics<parallel>], iteration_bounds = array<i64: 2>, scalar_prefetch = 0 : i64, scratch_operands = 0 : i64, tpu.core_type = #tpu.core_type<tc>, window_params = [{transform_indices = @transform_0, window_bounds = array<i64: 1, 8, 16>}, {pipeline_mode = #tpu.pipeline_mode<synchronous>, transform_indices = @transform_1, window_bounds = array<i64: 8, 8>}, {pipeline_mode = #tpu.pipeline_mode<synchronous>, transform_indices = @transform_2, window_bounds = array<i64: 16, 16>}, {pipeline_mode = #tpu.pipeline_mode<synchronous>, transform_indices = @transform_3, window_bounds = array<i64: 16, 2>}, {pipeline_mode = #tpu.pipeline_mode<synchronous>, transform_indices = @transform_4, window_bounds = array<i64: 2, 16>}, {pipeline_mode = #tpu.pipeline_mode<synchronous>, transform_indices = @transform_5, window_bounds = array<i64: 16, 4>}, {pipeline_mode = #tpu.pipeline_mode<synchronous>, transform_indices = @transform_6, window_bounds = array<i64: 4, 1>}, {pipeline_mode = #tpu.pipeline_mode<synchronous>, transform_indices = @transform_7, window_bounds = array<i64: 1, 4>}, {transform_indices = @transform_8, window_bounds = array<i64: 1, 8, 4>}]} {
    %c0 = arith.constant 0 : index
    %c0_0 = arith.constant 0 : index
    %c0_1 = arith.constant 0 : index
    %0 = vector.load %arg1[%c0, %c0_0, %c0_1] : memref<1x8x16xf32, #tpu.memory_space<vmem>>, vector<1x8x16xf32>
    %1 = vector.shape_cast %0 : vector<1x8x16xf32> to vector<8x16xf32>
    %c0_2 = arith.constant 0 : index
    %c0_3 = arith.constant 0 : index
    %2 = vector.load %arg2[%c0_2, %c0_3] : memref<8x8xf32, #tpu.memory_space<vmem>>, vector<8x8xf32>
    %c0_4 = arith.constant 0 : index
    %c0_5 = arith.constant 0 : index
    %3 = vector.load %arg3[%c0_4, %c0_5] : memref<16x16xf32, #tpu.memory_space<vmem>>, vector<16x16xf32>
    %cst = arith.constant dense<0.000000e+00> : vector<8x16xf32>
    %4 = tpu.matmul %1, %3, %cst {dimension_numbers = #tpu.dot_dimension_numbers<[1], [0], [0], [1], [0, 0, 1, 1], [], []>} : vector<8x16xf32>, vector<16x16xf32>, vector<8x16xf32> -> vector<8x16xf32>
    %cst_6 = arith.constant 0.000000e+00 : f32
    %5 = vector.broadcast %cst_6 : f32 to vector<8x16xf32>
    %6 = arith.cmpf ogt, %4, %5 : vector<8x16xf32>
    %cst_7 = arith.constant 2.000000e-01 : f32
    %7 = vector.broadcast %cst_7 : f32 to vector<8x16xf32>
    %8 = arith.mulf %7, %4 : vector<8x16xf32>
    %9 = arith.select %6, %4, %8 : vector<8x16xi1>, vector<8x16xf32>
    %c0_8 = arith.constant 0 : index
    %c0_9 = arith.constant 0 : index
    %10 = vector.load %arg4[%c0_8, %c0_9] : memref<16x2xf32, #tpu.memory_space<vmem>>, vector<16x2xf32>
    %cst_10 = arith.constant dense<0.000000e+00> : vector<8x2xf32>
    %11 = tpu.matmul %9, %10, %cst_10 {dimension_numbers = #tpu.dot_dimension_numbers<[1], [0], [0], [1], [0, 0, 1, 1], [], []>} : vector<8x16xf32>, vector<16x2xf32>, vector<8x2xf32> -> vector<8x2xf32>
    %c0_11 = arith.constant 0 : index
    %c0_12 = arith.constant 0 : index
    %12 = vector.load %arg5[%c0_11, %c0_12] : memref<2x16xf32, #tpu.memory_space<vmem>>, vector<2x16xf32>
    %cst_13 = arith.constant dense<0.000000e+00> : vector<2x8xf32>
    %13 = tpu.matmul %12, %9, %cst_13 {dimension_numbers = #tpu.dot_dimension_numbers<[1], [1], [0], [0], [0, 0, 1, 0], [], []>} : vector<2x16xf32>, vector<8x16xf32>, vector<2x8xf32> -> vector<2x8xf32>
    %14 = vector.extract_strided_slice %11 {offsets = [0, 0], sizes = [8, 1], strides = [1, 1]} : vector<8x2xf32> to vector<8x1xf32>
    %15 = vector.extract_strided_slice %13 {offsets = [0, 0], sizes = [1, 8], strides = [1, 1]} : vector<2x8xf32> to vector<1x8xf32>
    %16 = vector.broadcast %14 : vector<8x1xf32> to vector<8x8xf32>
    %17 = vector.broadcast %15 : vector<1x8xf32> to vector<8x8xf32>
    %18 = arith.addf %16, %17 : vector<8x8xf32>
    %19 = vector.extract_strided_slice %4 {offsets = [0, 0], sizes = [8, 8], strides = [1, 1]} : vector<8x16xf32> to vector<8x8xf32>
    %cst_14 = arith.constant 8.000000e-01 : f32
    %20 = vector.broadcast %cst_14 : f32 to vector<8x8xf32>
    %21 = arith.mulf %20, %2 : vector<8x8xf32>
    %cst_15 = arith.constant 2.000000e-01 : f32
    %22 = vector.broadcast %cst_15 : f32 to vector<8x8xf32>
    %23 = arith.mulf %22, %18 : vector<8x8xf32>
    %24 = arith.addf %21, %23 : vector<8x8xf32>
    %cst_16 = arith.constant 0.000000e+00 : f32
    %25 = vector.broadcast %cst_16 : f32 to vector<8x8xf32>
    %26 = arith.cmpf ogt, %24, %25 : vector<8x8xf32>
    %cst_17 = arith.constant -9.99999995E+11 : f32
    %27 = vector.broadcast %cst_17 : f32 to vector<8x8xf32>
    %28 = arith.select %26, %24, %27 : vector<8x8xi1>, vector<8x8xf32>
    %cst_18 = arith.constant dense<0xFF800000> : vector<8xf32>
    %29 = vector.multi_reduction <maximumf>, %28, %cst_18 [0] : vector<8x8xf32> to vector<8xf32>
    %30 = vector.shape_cast %29 : vector<8xf32> to vector<1x8xf32>
    %31 = vector.broadcast %30 : vector<1x8xf32> to vector<8x8xf32>
    %32 = arith.subf %28, %31 : vector<8x8xf32>
    %33 = math.exp %32 : vector<8x8xf32>
    %cst_19 = arith.constant dense<0.000000e+00> : vector<8xf32>
    %34 = vector.multi_reduction <add>, %33, %cst_19 [0] : vector<8x8xf32> to vector<8xf32>
    %35 = vector.shape_cast %34 : vector<8xf32> to vector<1x8xf32>
    %36 = tpu.reciprocal %35 {approx = true} : vector<1x8xf32> -> vector<1x8xf32>
    %37 = vector.broadcast %36 : vector<1x8xf32> to vector<8x8xf32>
    %38 = arith.mulf %33, %37 : vector<8x8xf32>
    %cst_20 = arith.constant dense<0.000000e+00> : vector<8x8xf32>
    %39 = tpu.matmul %38, %19, %cst_20 {dimension_numbers = #tpu.dot_dimension_numbers<[1], [0], [0], [1], [0, 0, 1, 1], [], []>} : vector<8x8xf32>, vector<8x8xf32>, vector<8x8xf32> -> vector<8x8xf32>
    %cst_21 = arith.constant 0.000000e+00 : f32
    %40 = vector.broadcast %cst_21 : f32 to vector<8x8xf32>
    %41 = arith.maximumf %39, %40 : vector<8x8xf32>
    %42 = vector.extract_strided_slice %11 {offsets = [0, 1], sizes = [8, 1], strides = [1, 1]} : vector<8x2xf32> to vector<8x1xf32>
    %43 = vector.extract_strided_slice %13 {offsets = [1, 0], sizes = [1, 8], strides = [1, 1]} : vector<2x8xf32> to vector<1x8xf32>
    %44 = vector.broadcast %42 : vector<8x1xf32> to vector<8x8xf32>
    %45 = vector.broadcast %43 : vector<1x8xf32> to vector<8x8xf32>
    %46 = arith.addf %44, %45 : vector<8x8xf32>
    %47 = vector.extract_strided_slice %4 {offsets = [0, 8], sizes = [8, 8], strides = [1, 1]} : vector<8x16xf32> to vector<8x8xf32>
    %cst_22 = arith.constant 8.000000e-01 : f32
    %48 = vector.broadcast %cst_22 : f32 to vector<8x8xf32>
    %49 = arith.mulf %48, %2 : vector<8x8xf32>
    %cst_23 = arith.constant 2.000000e-01 : f32
    %50 = vector.broadcast %cst_23 : f32 to vector<8x8xf32>
    %51 = arith.mulf %50, %46 : vector<8x8xf32>
    %52 = arith.addf %49, %51 : vector<8x8xf32>
    %cst_24 = arith.constant 0.000000e+00 : f32
    %53 = vector.broadcast %cst_24 : f32 to vector<8x8xf32>
    %54 = arith.cmpf ogt, %52, %53 : vector<8x8xf32>
    %cst_25 = arith.constant -9.99999995E+11 : f32
    %55 = vector.broadcast %cst_25 : f32 to vector<8x8xf32>
    %56 = arith.select %54, %52, %55 : vector<8x8xi1>, vector<8x8xf32>
    %cst_26 = arith.constant dense<0xFF800000> : vector<8xf32>
    %57 = vector.multi_reduction <maximumf>, %56, %cst_26 [0] : vector<8x8xf32> to vector<8xf32>
    %58 = vector.shape_cast %57 : vector<8xf32> to vector<1x8xf32>
    %59 = vector.broadcast %58 : vector<1x8xf32> to vector<8x8xf32>
    %60 = arith.subf %56, %59 : vector<8x8xf32>
    %61 = math.exp %60 : vector<8x8xf32>
    %cst_27 = arith.constant dense<0.000000e+00> : vector<8xf32>
    %62 = vector.multi_reduction <add>, %61, %cst_27 [0] : vector<8x8xf32> to vector<8xf32>
    %63 = vector.shape_cast %62 : vector<8xf32> to vector<1x8xf32>
    %64 = tpu.reciprocal %63 {approx = true} : vector<1x8xf32> -> vector<1x8xf32>
    %65 = vector.broadcast %64 : vector<1x8xf32> to vector<8x8xf32>
    %66 = arith.mulf %61, %65 : vector<8x8xf32>
    %cst_28 = arith.constant dense<0.000000e+00> : vector<8x8xf32>
    %67 = tpu.matmul %66, %47, %cst_28 {dimension_numbers = #tpu.dot_dimension_numbers<[1], [0], [0], [1], [0, 0, 1, 1], [], []>} : vector<8x8xf32>, vector<8x8xf32>, vector<8x8xf32> -> vector<8x8xf32>
    %cst_29 = arith.constant 0.000000e+00 : f32
    %68 = vector.broadcast %cst_29 : f32 to vector<8x8xf32>
    %69 = arith.maximumf %67, %68 : vector<8x8xf32>
    %70 = tpu.concatenate %41, %69 in 1 : vector<8x8xf32>, vector<8x8xf32> -> vector<8x16xf32>
    %c0_30 = arith.constant 0 : index
    %c0_31 = arith.constant 0 : index
    %71 = vector.load %arg6[%c0_30, %c0_31] : memref<16x4xf32, #tpu.memory_space<vmem>>, vector<16x4xf32>
    %cst_32 = arith.constant dense<0.000000e+00> : vector<8x4xf32>
    %72 = tpu.matmul %70, %71, %cst_32 {dimension_numbers = #tpu.dot_dimension_numbers<[1], [0], [0], [1], [0, 0, 1, 1], [], []>} : vector<8x16xf32>, vector<16x4xf32>, vector<8x4xf32> -> vector<8x4xf32>
    %cst_33 = arith.constant 0.000000e+00 : f32
    %73 = vector.broadcast %cst_33 : f32 to vector<8x4xf32>
    %74 = arith.cmpf ogt, %72, %73 : vector<8x4xf32>
    %cst_34 = arith.constant 2.000000e-01 : f32
    %75 = vector.broadcast %cst_34 : f32 to vector<8x4xf32>
    %76 = arith.mulf %75, %72 : vector<8x4xf32>
    %77 = arith.select %74, %72, %76 : vector<8x4xi1>, vector<8x4xf32>
    %c0_35 = arith.constant 0 : index
    %c0_36 = arith.constant 0 : index
    %78 = vector.load %arg7[%c0_35, %c0_36] : memref<4x1xf32, #tpu.memory_space<vmem>>, vector<4x1xf32>
    %cst_37 = arith.constant dense<0.000000e+00> : vector<8x1xf32>
    %79 = tpu.matmul %77, %78, %cst_37 {dimension_numbers = #tpu.dot_dimension_numbers<[1], [0], [0], [1], [0, 0, 1, 1], [], []>} : vector<8x4xf32>, vector<4x1xf32>, vector<8x1xf32> -> vector<8x1xf32>
    %c0_38 = arith.constant 0 : index
    %c0_39 = arith.constant 0 : index
    %80 = vector.load %arg8[%c0_38, %c0_39] : memref<1x4xf32, #tpu.memory_space<vmem>>, vector<1x4xf32>
    %cst_40 = arith.constant dense<0.000000e+00> : vector<1x8xf32>
    %81 = tpu.matmul %80, %77, %cst_40 {dimension_numbers = #tpu.dot_dimension_numbers<[1], [1], [0], [0], [0, 0, 1, 0], [], []>} : vector<1x4xf32>, vector<8x4xf32>, vector<1x8xf32> -> vector<1x8xf32>
    %82 = vector.broadcast %79 : vector<8x1xf32> to vector<8x8xf32>
    %83 = vector.broadcast %81 : vector<1x8xf32> to vector<8x8xf32>
    %84 = arith.addf %82, %83 : vector<8x8xf32>
    %cst_41 = arith.constant 8.000000e-01 : f32
    %85 = vector.broadcast %cst_41 : f32 to vector<8x8xf32>
    %86 = arith.mulf %85, %2 : vector<8x8xf32>
    %cst_42 = arith.constant 2.000000e-01 : f32
    %87 = vector.broadcast %cst_42 : f32 to vector<8x8xf32>
    %88 = arith.mulf %87, %84 : vector<8x8xf32>
    %89 = arith.addf %86, %88 : vector<8x8xf32>
    %cst_43 = arith.constant 0.000000e+00 : f32
    %90 = vector.broadcast %cst_43 : f32 to vector<8x8xf32>
    %91 = arith.cmpf ogt, %89, %90 : vector<8x8xf32>
    %cst_44 = arith.constant -9.99999995E+11 : f32
    %92 = vector.broadcast %cst_44 : f32 to vector<8x8xf32>
    %93 = arith.select %91, %89, %92 : vector<8x8xi1>, vector<8x8xf32>
    %cst_45 = arith.constant dense<0xFF800000> : vector<8xf32>
    %94 = vector.multi_reduction <maximumf>, %93, %cst_45 [0] : vector<8x8xf32> to vector<8xf32>
    %95 = vector.shape_cast %94 : vector<8xf32> to vector<1x8xf32>
    %96 = vector.broadcast %95 : vector<1x8xf32> to vector<8x8xf32>
    %97 = arith.subf %93, %96 : vector<8x8xf32>
    %98 = math.exp %97 : vector<8x8xf32>
    %cst_46 = arith.constant dense<0.000000e+00> : vector<8xf32>
    %99 = vector.multi_reduction <add>, %98, %cst_46 [0] : vector<8x8xf32> to vector<8xf32>
    %100 = vector.shape_cast %99 : vector<8xf32> to vector<1x8xf32>
    %101 = tpu.reciprocal %100 {approx = true} : vector<1x8xf32> -> vector<1x8xf32>
    %102 = vector.broadcast %101 : vector<1x8xf32> to vector<8x8xf32>
    %103 = arith.mulf %98, %102 : vector<8x8xf32>
    %cst_47 = arith.constant dense<0.000000e+00> : vector<8x4xf32>
    %104 = tpu.matmul %103, %72, %cst_47 {dimension_numbers = #tpu.dot_dimension_numbers<[1], [0], [0], [1], [0, 0, 1, 1], [], []>} : vector<8x8xf32>, vector<8x4xf32>, vector<8x4xf32> -> vector<8x4xf32>
    %cst_48 = arith.constant 0.000000e+00 : f32
    %105 = vector.broadcast %cst_48 : f32 to vector<8x4xf32>
    %106 = arith.maximumf %104, %105 : vector<8x4xf32>
    %cst_49 = arith.constant 0.000000e+00 : f32
    %107 = vector.broadcast %cst_49 : f32 to vector<8x4xf32>
    %108 = arith.cmpf ogt, %106, %107 : vector<8x4xf32>
    %cst_50 = arith.constant 0.000000e+00 : f32
    %109 = vector.broadcast %cst_50 : f32 to vector<8x4xf32>
    %110 = arith.minimumf %106, %109 : vector<8x4xf32>
    %111 = math.exp %110 : vector<8x4xf32>
    %cst_51 = arith.constant 1.000000e+00 : f32
    %112 = vector.broadcast %cst_51 : f32 to vector<8x4xf32>
    %113 = arith.subf %111, %112 : vector<8x4xf32>
    %114 = arith.select %108, %106, %113 : vector<8x4xi1>, vector<8x4xf32>
    %cst_52 = arith.constant dense<0xFF800000> : vector<8xf32>
    %115 = vector.multi_reduction <maximumf>, %114, %cst_52 [1] : vector<8x4xf32> to vector<8xf32>
    %116 = vector.shape_cast %115 : vector<8xf32> to vector<8x1xf32>
    %117 = vector.broadcast %116 : vector<8x1xf32> to vector<8x4xf32>
    %118 = arith.subf %114, %117 : vector<8x4xf32>
    %119 = math.exp %118 : vector<8x4xf32>
    %cst_53 = arith.constant dense<0.000000e+00> : vector<8xf32>
    %120 = vector.multi_reduction <add>, %119, %cst_53 [1] : vector<8x4xf32> to vector<8xf32>
    %121 = vector.shape_cast %120 : vector<8xf32> to vector<8x1xf32>
    %122 = math.log %121 : vector<8x1xf32>
    %123 = vector.broadcast %122 : vector<8x1xf32> to vector<8x4xf32>
    %124 = arith.subf %118, %123 : vector<8x4xf32>
    %c0_54 = arith.constant 0 : index
    %c0_55 = arith.constant 0 : index
    %c0_56 = arith.constant 0 : index
    %125 = vector.load %arg9[%c0_54, %c0_55, %c0_56] : memref<1x8x4xf32, #tpu.memory_space<vmem>>, vector<1x8x4xf32>
    %126 = vector.shape_cast %125 : vector<1x8x4xf32> to vector<8x4xf32>
    %127 = vector.shape_cast %124 : vector<8x4xf32> to vector<1x8x4xf32>
    tpu.vector_store %arg9[%c0_54, %c0_55, %c0_56], %127 {strides = array<i32>} : memref<1x8x4xf32, #tpu.memory_space<vmem>>, vector<1x8x4xf32>,
    return
  }
  func.func @transform_0(%arg0: i32) -> (i32, i32, i32) {
    %c0_i32 = arith.constant 0 : i32
    %c0_i32_0 = arith.constant 0 : i32
    %c0_i32_1 = arith.constant 0 : i32
    return %arg0, %c0_i32, %c0_i32_0 : i32, i32, i32
  }
  func.func @transform_1(%arg0: i32) -> (i32, i32) {
    %c0_i32 = arith.constant 0 : i32
    %c0_i32_0 = arith.constant 0 : i32
    %c0_i32_1 = arith.constant 0 : i32
    return %c0_i32, %c0_i32_0 : i32, i32
  }
  func.func @transform_2(%arg0: i32) -> (i32, i32) {
    %c0_i32 = arith.constant 0 : i32
    %c0_i32_0 = arith.constant 0 : i32
    %c0_i32_1 = arith.constant 0 : i32
    return %c0_i32, %c0_i32_0 : i32, i32
  }
  func.func @transform_3(%arg0: i32) -> (i32, i32) {
    %c0_i32 = arith.constant 0 : i32
    %c0_i32_0 = arith.constant 0 : i32
    %c0_i32_1 = arith.constant 0 : i32
    return %c0_i32, %c0_i32_0 : i32, i32
  }
  func.func @transform_4(%arg0: i32) -> (i32, i32) {
    %c0_i32 = arith.constant 0 : i32
    %c0_i32_0 = arith.constant 0 : i32
    %c0_i32_1 = arith.constant 0 : i32
    return %c0_i32, %c0_i32_0 : i32, i32
  }
  func.func @transform_5(%arg0: i32) -> (i32, i32) {
    %c0_i32 = arith.constant 0 : i32
    %c0_i32_0 = arith.constant 0 : i32
    %c0_i32_1 = arith.constant 0 : i32
    return %c0_i32, %c0_i32_0 : i32, i32
  }
  func.func @transform_6(%arg0: i32) -> (i32, i32) {
    %c0_i32 = arith.constant 0 : i32
    %c0_i32_0 = arith.constant 0 : i32
    %c0_i32_1 = arith.constant 0 : i32
    return %c0_i32, %c0_i32_0 : i32, i32
  }
  func.func @transform_7(%arg0: i32) -> (i32, i32) {
    %c0_i32 = arith.constant 0 : i32
    %c0_i32_0 = arith.constant 0 : i32
    %c0_i32_1 = arith.constant 0 : i32
    return %c0_i32, %c0_i32_0 : i32, i32
  }
  func.func @transform_8(%arg0: i32) -> (i32, i32, i32) {
    %c0_i32 = arith.constant 0 : i32
    %c0_i32_0 = arith.constant 0 : i32
    %c0_i32_1 = arith.constant 0 : i32
    return %arg0, %c0_i32, %c0_i32_0 : i32, i32, i32
  }
}

</mosaic_0001>

<bundles_post_ra>
// kernel: gat_forward.1
= control target key start
LH: loop header
LB: loop body
LE: loop exit
PB: predicated region body
PF: predicated region fallthrough
CT: control target
= control target key end

     0   :  { %s820_s27 = smov 0   ;;  %s900_s0 = inlined_call_operand.vmem [shape: f32[2,8,16], index: 0, kind: input, shape index: {}]   ;;  %s901_s1 = inlined_call_operand.vmem [shape: f32[8,8], index: 1, kind: input, shape index: {}]   ;;  %s902_s2 = inlined_call_operand.vmem [shape: f32[16,16], index: 2, kind: input, shape index: {}]   ;;  %s903_s3 = inlined_call_operand.vmem [shape: f32[16,2], index: 3, kind: input, shape index: {}]   ;;  %s904_s4 = inlined_call_operand.vmem [shape: f32[2,16], index: 4, kind: input, shape index: {}]   ;;  %s905_s5 = inlined_call_operand.vmem [shape: f32[16,4], index: 5, kind: input, shape index: {}]   ;;  %s906_s6 = inlined_call_operand.vmem [shape: f32[4,1], index: 6, kind: input, shape index: {}]   ;;  %s907_s7 = inlined_call_operand.vmem [shape: f32[1,4], index: 7, kind: input, shape index: {}]   ;;  %s908_s8 = inlined_call_operand.vmem [shape: f32[2,8,4], index: 8, kind: output, shape index: {}]  }
   0x1 LB: > { %s706_s28 = sadd.s32 4294967295, %s769_s27   ;;  %p710_p0 = scmp.ge.s32.totalorder %s769_s27, 1  ;;  %s769_s27 = sphi %s820_s27, %s18_s27  }
   0x2   : > { %p261_p1 = scmp.lt.s32.totalorder %s769_s27, 3 }
   0x4   : > { %p262_p2 = pnand %p710_p0, %p261_p1 }
   0x5   : > { %p293_p3 = scmp.lt.s32.totalorder (!%p262_p2), %s706_s28, 1  ;;  %s771_s19 = smov (!%p262_p2), 120  }
   0x6   : > { %265 = sbr.rel (%p262_p2) target bundleno = 1501 (0x5dd), region = 52  ;;  %s774_s30 = smov (!%p262_p2), 8  }
   0xb   : > { %v304_v0 = vld [vmem:[%s902_s2 + $0x8] sm:$0xff]  ;;  %v303_v1 = vld [vmem:[%s902_s2] sm:$0xff]  ;;  %s910_s28 = smov (!%p293_p3, %s706_s28), 1  ;;  %vm305_vm0 = vcmask 130048   ;;  %v772_v9 = vmov 0   ;;  %v773_v12 = vmov 1  }
   0xc   : > { %323 = vmatpush.msra.mxu0 %v304_v0  ;;  %s711_s11 = sshll.u32 %s910_s28, 3  ;;  %v333_v3 = vld [vmem:[%s903_s3 + $0x8] sm:$0xff]  ;;  %v332_v4 = vld [vmem:[%s903_s3] sm:$0xff]  ;;  %741 = vset.pattern.permute.xlu0 %v772_v9  ;;  %vm393_vm2 = vcmask 64512   ;;  %vm532_vm5 = vcmask 1043456   ;;  %vm528_vm7 = vcmask 31744  }
   0xd   : > { %s296_s14 = scalar_lea.vmem %s900_s0, %s711_s11  ;;  %351 = vmatpush.msra.mxu1 %v333_v3  ;;  %v357_v8 = vld [vmem:[%s904_s4] sm:$0x3]  ;;  %743 = vset.pattern.permute.xlu2 %v772_v9  ;;  %s300_s16 = scalar_lea.vmem %s908_s8, %s711_s11 }
   0xe   : > { %324 = vmatpush.msra.mxu0 %v303_v1  ;;  %v301_v2 = vld [vmem:[%s296_s14] sm:$0xff] }
   0xf   : > { %713 = vmatmul.msk.f32.vlgmr.msra.gmra.mxu0 %vm305_vm0, %v301_v2  ;;  %352 = vmatpush.msra.mxu1 %v332_v4  ;;  %v302_v15 = vld [vmem:[%s901_s1] sm:$0xff]  ;;  %v500_v2 = vld [vmem:[%s905_s5 + $0x8] sm:$0xff] }
  0x10   : > { %v858_v17 = vmul.f32 0.8, %v302_v15  ;;  %v499_v3 = vld [vmem:[%s905_s5] sm:$0xff]  ;;  %518 = vmatpush.msrb.mxu0 %v500_v2 }
  0x12   : > { %519 = vmatpush.msrb.mxu0 %v499_v3 }
  0x8c   : > { %v326_v5 = vpop.f32.mrf.mxu0 }
  0x8d   : > { %467 = vrot.lane.b32.xlu1 %v326_v5, %s771_s19  ;;  %431 = vmatpush.msra.mxu3 %v326_v5  ;;  %vm329_vm1 = vcmp.gt.f32.partialorder %v326_v5, 0.0  ;;  %v330_v6 = vmul.f32 0.2, %v326_v5 }
  0x8f   : > { %v331_v7 = vsel %vm329_vm1, %v326_v5, %v330_v6 }
  0x90   : > { %714 = vmatmul.msk.f32.vlgmr.msra.gmra.mxu1 %vm305_vm0, %v331_v7  ;;  %715 = vmatpush.xpose.msk.msra.mxu2 %vm305_vm0, %v331_v7  ;;  %v527_v7 = vld [vmem:[%s906_s6] sm:$0xf] }
  0x91   : > { %720 = vmatpush.msk.msrb.mxu1 %vm532_vm5, %v527_v7 }
  0x93   : > { %716 = vmatmul.msk.f32.vlgmr.msra.gmra.mxu2 %vm305_vm0, %v357_v8 }
  0xff   : > { %v468_v10 = vpop.permute.xlu1 %467 }
 0x100   : > { %488 = vmatpush.msrb.mxu3 %v468_v10 }
 0x10d   : > { %v354_v11 = vpop.f32.mrf.mxu1 }
 0x10e   : > { %383 = vperm.xlu0 %741, %v354_v11  }
 0x116   : > { %742 = vset.pattern.permute.xlu0 %v773_v12  ;;  %v378_v13 = vpop.f32.mrf.mxu2 }
 0x117   : > { %438 = vperm.xlu0 %742, %v354_v11   ;;  %v386_v14 = vperm.slane %v378_v13, 0  ;;  %v441_v21 = vperm.slane %v378_v13, 1 }
 0x11f   : > { %744 = vset.pattern.permute.xlu0 %v772_v9 }
 0x180   : > { %v384_v16 = vpop.permute.xlu0 %383 }
 0x181   : > { %v387_v18 = vadd.f32 %v386_v14, %v384_v16  ;;  %v556_v14 = vld [vmem:[%s907_s7] sm:$0x1] }
 0x183   : > { %v389_v19 = vmul.f32 0.2, %v387_v18 }
 0x185   : > { %v390_v20 = vadd.f32 %v389_v19, %v858_v17 }
 0x187   : > { %vm391_vm3 = vcmp.gt.f32.partialorder %v390_v20, 0.0 }
 0x188   : > { %v392_v22 = vsel %vm391_vm3, %v390_v20, -1e+12 }
 0x189   : > { %v394_v23 = vsel %vm393_vm2, %v392_v22, -inf  ;;  %v439_v24 = vpop.permute.xlu0 %438 }
 0x18a   : > { %v395_v25 = vrot.slane %v394_v23, 4  ;;  %v442_v26 = vadd.f32 %v441_v21, %v439_v24 }
 0x18c   : > { %v396_v27 = vmax.f32 %v394_v23, %v395_v25  ;;  %v443_v28 = vmul.f32 0.2, %v442_v26 }
 0x18e   : > { %v397_v29 = vrot.slane %v396_v27, 2  ;;  %v444_v30 = vadd.f32 %v443_v28, %v858_v17 }
 0x190   : > { %v398_v31 = vmax.f32 %v396_v27, %v397_v29  ;;  %vm445_vm4 = vcmp.gt.f32.partialorder %v444_v30, 0.0 }
 0x191   : > { %v446_v32 = vsel %vm445_vm4, %v444_v30, -1e+12 }
 0x192   : > { %v399_v33 = vrot.slane %v398_v31, 1  ;;  %v447_v34 = vsel %vm393_vm2, %v446_v32, -inf }
 0x193   : > { %v448_v35 = vrot.slane %v447_v34, 4 }
 0x194   : > { %v400_v36 = vmax.f32 %v398_v31, %v399_v33 }
 0x195   : > { %v449_v37 = vmax.f32 %v447_v34, %v448_v35 }
 0x196   : > { %v401_v38 = vsub.f32 %v392_v22, %v400_v36 }
 0x197   : > { %v450_v39 = vrot.slane %v449_v37, 2 }
 0x198   : > { %v402_v40 = vmul.f32 1.442695, %v401_v38 }
 0x199   : > { %v451_v41 = vmax.f32 %v449_v37, %v450_v39 }
 0x19a   : > { %745 = vpow2.f32 %v402_v40 }
 0x19b   : > { %v452_v42 = vrot.slane %v451_v41, 1 }
 0x19d   : > { %v453_v43 = vmax.f32 %v451_v41, %v452_v42 }
 0x19f   : > { %v454_v44 = vsub.f32 %v446_v32, %v453_v43 }
 0x1a0   : > { %v746_v45 = vpop.eup %745 }
 0x1a1   : > { %v404_v46 = vsel %vm393_vm2, %v746_v45, 0.0  ;;  %v455_v47 = vmul.f32 1.442695, %v454_v44 }
 0x1a2   : > { %v405_v48 = vrot.slane %v404_v46, 4 }
 0x1a3   : > { %747 = vpow2.f32 %v455_v47 }
 0x1a4   : > { %v406_v49 = vadd.f32 %v405_v48, %v404_v46 }
 0x1a6   : > { %v407_v50 = vrot.slane %v406_v49, 2 }
 0x1a8   : > { %v408_v51 = vadd.f32 %v407_v50, %v406_v49 }
 0x1a9   : > { %v748_v52 = vpop.eup %747 }
 0x1aa   : > { %v457_v53 = vsel %vm393_vm2, %v748_v52, 0.0  ;;  %v409_v54 = vrot.slane %v408_v51, 1 }
 0x1ab   : > { %v458_v55 = vrot.slane %v457_v53, 4 }
 0x1ac   : > { %v410_v56 = vadd.f32 %v409_v54, %v408_v51 }
 0x1ad   : > { %v459_v57 = vadd.f32 %v458_v55, %v457_v53 }
 0x1ae   : > { %749 = vrcp.f32 %v410_v56 }
 0x1af   : > { %v460_v58 = vrot.slane %v459_v57, 2 }
 0x1b1   : > { %v461_v59 = vadd.f32 %v460_v58, %v459_v57 }
 0x1b3   : > { %v462_v60 = vrot.slane %v461_v59, 1 }
 0x1b4   : > { %v750_v61 = vpop.eup %749 }
 0x1b5   : > { %v412_v62 = vmul.f32 %v750_v61, %v746_v45  ;;  %v463_v63 = vadd.f32 %v462_v60, %v461_v59 }
 0x1b7   : > { %717 = vmatmul.msk.f32.vlgmr.msra.gmra.mxu3 %vm393_vm2, %v412_v62  ;;  %751 = vrcp.f32 %v463_v63 }
 0x1bd   : > { %v752_v0 = vpop.eup %751 }
 0x1be   : > { %v465_v1 = vmul.f32 %v752_v0, %v748_v52 }
 0x1c0   : > { %718 = vmatmul.msk.f32.vlgmr.msrb.gmra.mxu3 %vm393_vm2, %v465_v1 }
 0x23a   : > { %v433_v4 = vpop.f32.mrf.mxu3 }
 0x23b   : > { %v436_v8 = vmax.f32 %v433_v4, 0.0 }
 0x243   : > { %v490_v5 = vpop.f32.mrf.mxu3 }
 0x244   : > { %v493_v6 = vmax.f32 %v490_v5, 0.0 }
 0x246   : > { %495 = vrot.lane.b32.xlu1 %v493_v6, %s774_s30 }
 0x2b8   : > { %v496_v9 = vpop.permute.xlu1 %495 }
 0x2b9   : > { %v498_v10 = vsel %vm393_vm2, %v436_v8, %v496_v9 }
 0x2ba   : > { %719 = vmatmul.msk.f32.vlgmr.msrb.gmra.mxu0 %vm305_vm0, %v498_v10 }
 0x337   : > { %v521_v11 = vpop.f32.mrf.mxu0 }
 0x338   : > { %vm524_vm6 = vcmp.gt.f32.partialorder %v521_v11, 0.0  ;;  %v525_v12 = vmul.f32 0.2, %v521_v11  ;;  %628 = vmatpush.msra.mxu3 %v521_v11 }
 0x33a   : > { %v526_v13 = vsel %vm524_vm6, %v521_v11, %v525_v12 }
 0x33b   : > { %721 = vmatmul.msk.f32.vlgmr.msrb.gmra.mxu1 %vm528_vm7, %v526_v13  ;;  %722 = vmatpush.xpose.msk.msrb.mxu2 %vm528_vm7, %v526_v13 }
 0x33e   : > { %723 = vmatmul.msk.f32.vlgmr.msrb.gmra.mxu2 %vm528_vm7, %v556_v14 }
 0x3b8   : > { %v553_v15 = vpop.f32.mrf.mxu1 }
 0x3b9   : > { %582 = vperm.xlu2 %743, %v553_v15  }
 0x3c1   : > { %v577_v16 = vpop.f32.mrf.mxu2 }
 0x3c2   : > { %v585_v18 = vperm.slane %v577_v16, 0 }
 0x413   : > { %v583_v19 = vpop.permute.xlu2 %582 }
 0x414   : > { %v586_v20 = vadd.f32 %v585_v18, %v583_v19 }
 0x416   : > { %v587_v21 = vmul.f32 0.2, %v586_v20 }
 0x418   : > { %v588_v22 = vadd.f32 %v587_v21, %v858_v17 }
 0x41a   : > { %vm589_vm8 = vcmp.gt.f32.partialorder %v588_v22, 0.0 }
 0x41b   : > { %v590_v23 = vsel %vm589_vm8, %v588_v22, -1e+12 }
 0x41c   : > { %v591_v24 = vsel %vm393_vm2, %v590_v23, -inf }
 0x41d   : > { %v592_v25 = vrot.slane %v591_v24, 4 }
 0x41f   : > { %v593_v26 = vmax.f32 %v591_v24, %v592_v25 }
 0x421   : > { %v594_v27 = vrot.slane %v593_v26, 2 }
 0x423   : > { %v595_v28 = vmax.f32 %v593_v26, %v594_v27 }
 0x425   : > { %v596_v29 = vrot.slane %v595_v28, 1 }
 0x427   : > { %v597_v30 = vmax.f32 %v595_v28, %v596_v29 }
 0x429   : > { %v598_v31 = vsub.f32 %v590_v23, %v597_v30 }
 0x42b   : > { %v599_v32 = vmul.f32 1.442695, %v598_v31 }
 0x42d   : > { %753 = vpow2.f32 %v599_v32 }
 0x433   : > { %v754_v33 = vpop.eup %753 }
 0x434   : > { %v601_v34 = vsel %vm393_vm2, %v754_v33, 0.0 }
 0x435   : > { %v602_v35 = vrot.slane %v601_v34, 4 }
 0x437   : > { %v603_v36 = vadd.f32 %v602_v35, %v601_v34 }
 0x439   : > { %v604_v37 = vrot.slane %v603_v36, 2 }
 0x43b   : > { %v605_v17 = vadd.f32 %v604_v37, %v603_v36 }
 0x43d   : > { %v606_v38 = vrot.slane %v605_v17, 1 }
 0x43f   : > { %v607_v39 = vadd.f32 %v606_v38, %v605_v17 }
 0x441   : > { %755 = vrcp.f32 %v607_v39 }
 0x447   : > { %v756_v40 = vpop.eup %755 }
 0x448   : > { %v609_v41 = vmul.f32 %v756_v40, %v754_v33 }
 0x44a   : > { %724 = vmatmul.msk.f32.vlgmr.msra.gmra.mxu3 %vm393_vm2, %v609_v41 }
 0x4cd   : > { %v630_v42 = vpop.f32.mrf.mxu3 }
 0x4ce   : > { %v725_v43 = vclamps-f32 %v630_v42, 0.0  ;;  %v633_v45 = vmax.f32 %v630_v42, 0.0 }
 0x4d0   : > { %v636_v44 = vmul.f32 1.442695, %v725_v43  ;;  %vm634_vm9 = vcmp.gt.f32.partialorder %v633_v45, 0.0 }
 0x4d2   : > { %757 = vpow2.f32 %v636_v44 }
 0x4d8   : > { %v758_v46 = vpop.eup %757 }
 0x4d9   : > { %v726_v47 = vadd.f32 -1.0, %v758_v46 }
 0x4db   : > { %v639_v48 = vsel %vm634_vm9, %v633_v45, %v726_v47 }
 0x4dc   : > { %v640_v49 = vsel %vm528_vm7, %v639_v48, -inf }
 0x4dd   : > { %641 = vmax.xlane.f32.xlu2 %v640_v49 }
 0x550   : > { %v642_v50 = vpop.xlane.xlu2 %641 }
 0x551   : > { %v643_v51 = vsub.f32 %v639_v48, %v642_v50 }
 0x553   : > { %v644_v52 = vmul.f32 1.442695, %v643_v51 }
 0x555   : > { %759 = vpow2.f32 %v644_v52 }
 0x55b   : > { %v760_v53 = vpop.eup %759 }
 0x55c   : > { %v646_v54 = vsel %vm528_vm7, %v760_v53, 0.0 }
 0x55d   : > { %647 = vadd.xlane.f32.xlu1 %v646_v54 }
 0x5d0   : > { %v648_v55 = vpop.xlane.xlu1 %647 }
 0x5d1   : > { %761 = vlog2.f32 %v648_v55 }
 0x5d7   : > { %v762_v56 = vpop.eup %761 }
 0x5d8   : > { %v650_v57 = vmul.f32 0.6931472, %v762_v56 }
 0x5da   : > { %v651_v58 = vsub.f32 %v643_v51, %v650_v57 }
 0x5dc   : > { %652 = vst.msk [vmem:[%s300_s16] sm:$0xff] %vm528_vm7, %v651_v58 }
 0x5dd PF: > { %s18_s27 = sadd.s32 1, %s769_s27  }
 0x5de   : > { %p15_p4 = scmp.ge.s32.totalorder %s18_s27, 4  }
 0x5e0   :  { %17 = sbr.rel (!%p15_p4) target bundleno = 1 (0x1), region = 82 }

</bundles_post_ra>
